<compile_context>
chip_gen: v7x
topology: tpu7x:2x2x1
jax: 0.10.0
libtpu: 0.0.40
codegen_flags: <defaults>
</compile_context>

<pallas_src>
import jax
import jax.numpy as jnp
from jax.experimental import pallas as pl
from jax.experimental.pallas import tpu as pltpu

_TARGET_BLOCK_BYTES = 4 * 1024 * 1024   # ~4 MiB per stream block (widest dtype)
_MAX_TILE_COLS = 2048                   # lane-tile cap when last dim is huge (mult. of 128)
_SMALL_INPUT_BYTES = 1 * 1024 * 1024    # below this, fused XLA maximum is faster


def _max_kernel(x_ref, y_ref, o_ref):
    # In-kernel dtype promotion: loads stay in the inputs' native dtypes so HBM
    # read traffic is minimal; the casts are free VPU work in a DMA-bound kernel.
    o_ref[...] = jnp.maximum(x_ref[...].astype(o_ref.dtype),
                             y_ref[...].astype(o_ref.dtype))


def _choose_tiles(rows: int, cols: int, itemsizes) -> tuple[int, int]:
    """Pick a block shape ~_TARGET_BLOCK_BYTES for the widest stream.

    Legality: each block dim is either a multiple of (32, 128) — which covers
    the (8,128) layout constraint for f32/bf16/int8 — or equals the full array
    dim.  Ragged edges (blocks not dividing the array) are masked by Pallas.
    """
    max_is = max(itemsizes)
    if cols <= _MAX_TILE_COLS:
        tile_c = cols                       # full dim: always layout-legal
    else:
        tile_c = _MAX_TILE_COLS             # multiple of 128; ragged edge masked

    budget_rows = max(1, _TARGET_BLOCK_BYTES // (tile_c * max_is))
    if rows <= budget_rows:
        tile_r = rows                       # full dim: always layout-legal
    else:
        tile_r = max(32, (budget_rows // 32) * 32)   # multiple of 32
    return tile_r, tile_c


def eltwise_max(x: jax.Array, y: jax.Array, *,
                min_pallas_bytes: int = _SMALL_INPUT_BYTES) -> jax.Array:
    """Elementwise maximum matching torch.max(x, y) (broadcasting + promotion)."""
    x = jnp.asarray(x)
    y = jnp.asarray(y)
    out_shape = jnp.broadcast_shapes(x.shape, y.shape)
    out_dtype = jnp.result_type(x.dtype, y.dtype)

    # Broadcasting case: never materialize the broadcast in HBM.  XLA's fused
    # elementwise maximum folds the broadcast in-register and is already at the
    # bandwidth roofline for scalar / row / channel broadcasts.
    if x.shape != y.shape:
        # TODO(synk): add a pinned-BlockSpec Pallas path for row/channel broadcasts.
        return jnp.maximum(x, y)

    n = x.size
    out_itemsize = jnp.dtype(out_dtype).itemsize
    total_bytes = n * (x.dtype.itemsize + y.dtype.itemsize + out_itemsize)
    if n == 0 or total_bytes < min_pallas_bytes:
        # Small-input fast path: pallas_call launch overhead would dominate.
        return jnp.maximum(x, y)

    # Collapse leading dims into rows, keep the original trailing dim as the
    # lane axis.  Pure reshape on contiguous data -> no HBM copy.
    if x.ndim >= 2:
        cols = x.shape[-1]
        rows = n // cols
    else:
        if n % 512 == 0:
            rows, cols = n // 512, 512
        else:
            rows, cols = 1, n

    x2 = x.reshape(rows, cols)
    y2 = y.reshape(rows, cols)

    tile_r, tile_c = _choose_tiles(
        rows, cols, (x.dtype.itemsize, y.dtype.itemsize, out_itemsize))
    grid = (pl.cdiv(rows, tile_r), pl.cdiv(cols, tile_c))

    # Honest traffic estimate: per-input native itemsize, no padding copies.
    cost = pl.CostEstimate(flops=n, transcendentals=0, bytes_accessed=total_bytes)

    out2 = pl.pallas_call(
        _max_kernel,
        out_shape=jax.ShapeDtypeStruct((rows, cols), out_dtype),
        grid_spec=pltpu.PrefetchScalarGridSpec(
            num_scalar_prefetch=0,
            grid=grid,
            in_specs=[
                pl.BlockSpec((tile_r, tile_c), lambda i, j: (i, j)),
                pl.BlockSpec((tile_r, tile_c), lambda i, j: (i, j)),
            ],
            out_specs=pl.BlockSpec((tile_r, tile_c), lambda i, j: (i, j)),
        ),
        compiler_params=pltpu.CompilerParams(
            # Both axes are independent grid axes.
            # TODO(synk): on v7x, verify in a trace that both TensorCores issue
            # DMAs; if not, switch the row axis to pltpu.CORE_PARALLEL.
            dimension_semantics=("parallel", "parallel"),
            vmem_limit_bytes=32 * 1024 * 1024,  # >= 3 streams x 2 bufs x <=4 MiB
        ),
        cost_estimate=cost,
    )(x2, y2)

    return out2.reshape(out_shape)


if __name__ == "__main__":
    key = jax.random.PRNGKey(0)
    kx, ky, ka, kb, kc, kd = jax.random.split(key, 6)

    # 1) Canonical small NCHW shape from the eltwise test module (fast path).
    shape = (2, 4, 16, 16)
    x = jax.random.normal(kx, shape, dtype=jnp.float32)
    y = jax.random.normal(ky, shape, dtype=jnp.float32)
    out = jax.block_until_ready(eltwise_max(x, y))
    assert out.shape == shape and out.dtype == x.dtype
    assert jnp.array_equal(out, jnp.maximum(x, y))

    # 2) Same small shape forced through the Pallas kernel path.
    out_p = jax.block_until_ready(eltwise_max(x, y, min_pallas_bytes=0))
    assert out_p.shape == shape and out_p.dtype == x.dtype
    assert jnp.array_equal(out_p, jnp.maximum(x, y))

    # 3) Larger, non-divisible trailing dim: ragged lane edge handled in-kernel
    #    (no pad / slice copies), multi-stream Pallas path.
    shape2 = (2, 8, 128, 130)
    a = jax.random.normal(ka, shape2, dtype=jnp.float32)
    b = jax.random.normal(kb, shape2, dtype=jnp.float32)
    out2 = jax.block_until_ready(eltwise_max(a, b))
    assert out2.shape == shape2 and out2.dtype == jnp.float32
    assert jnp.array_equal(out2, jnp.maximum(a, b))

    # 4) Mixed precision: bf16 input promoted inside the kernel (reads stay bf16).
    c = jax.random.normal(kc, (4, 256, 384), dtype=jnp.float32)
    d = jax.random.normal(kd, (4, 256, 384), dtype=jnp.bfloat16)
    out3 = jax.block_until_ready(eltwise_max(c, d, min_pallas_bytes=0))
    assert out3.dtype == jnp.float32
    assert jnp.array_equal(out3, jnp.maximum(c, d))

    # 5) Scalar broadcast: fused-XLA fallback (no materialized broadcast).
    out4 = jax.block_until_ready(eltwise_max(x, jnp.float32(0.0)))
    assert jnp.array_equal(out4, jnp.maximum(x, 0.0))

    print("KERNEL_OK")
</pallas_src>

<mosaic_0001>
module attributes {stable_mosaic.version = 11 : i64} {
  func.func @_max_kernel(%arg0: i32, %arg1: i32, %arg2: memref<128x16xf32, #tpu.memory_space<vmem>>, %arg3: memref<128x16xf32, #tpu.memory_space<vmem>>, %arg4: memref<128x16xf32, #tpu.memory_space<vmem>>) attributes {dimension_semantics = [#tpu.dimension_semantics<parallel>, #tpu.dimension_semantics<parallel>], iteration_bounds = array<i64: 1, 1>, scalar_prefetch = 0 : i64, scratch_operands = 0 : i64, tpu.core_type = #tpu.core_type<tc>, window_params = [{transform_indices = @transform_0, window_bounds = array<i64: 128, 16>}, {transform_indices = @transform_1, window_bounds = array<i64: 128, 16>}, {transform_indices = @transform_2, window_bounds = array<i64: 128, 16>}]} {
    %c0 = arith.constant 0 : index
    %c0_0 = arith.constant 0 : index
    %0 = vector.load %arg2[%c0, %c0_0] : memref<128x16xf32, #tpu.memory_space<vmem>>, vector<128x16xf32>
    %c0_1 = arith.constant 0 : index
    %c0_2 = arith.constant 0 : index
    %1 = vector.load %arg3[%c0_1, %c0_2] : memref<128x16xf32, #tpu.memory_space<vmem>>, vector<128x16xf32>
    %2 = arith.maximumf %0, %1 : vector<128x16xf32>
    %c0_3 = arith.constant 0 : index
    %c0_4 = arith.constant 0 : index
    %3 = vector.load %arg4[%c0_3, %c0_4] : memref<128x16xf32, #tpu.memory_space<vmem>>, vector<128x16xf32>
    tpu.vector_store %arg4[%c0_3, %c0_4], %2 {strides = array<i32>} : memref<128x16xf32, #tpu.memory_space<vmem>>, vector<128x16xf32>,
    return
  }
  func.func @transform_0(%arg0: i32, %arg1: i32) -> (i32, i32) {
    %c0_i32 = arith.constant 0 : i32
    return %arg0, %arg1 : i32, i32
  }
  func.func @transform_1(%arg0: i32, %arg1: i32) -> (i32, i32) {
    %c0_i32 = arith.constant 0 : i32
    return %arg0, %arg1 : i32, i32
  }
  func.func @transform_2(%arg0: i32, %arg1: i32) -> (i32, i32) {
    %c0_i32 = arith.constant 0 : i32
    return %arg0, %arg1 : i32, i32
  }
}

</mosaic_0001>

<bundles_post_ra>
// kernel: tpu_custom_call.1
= control target key start
LH: loop header
LB: loop body
LE: loop exit
PB: predicated region body
PF: predicated region fallthrough
CT: control target
= control target key end

     0   :  { %vm59_vm0 = vcmask 130048   ;;  %s255_s0 = inlined_call_operand.vmem [shape: f32[128,16], index: 0, kind: input, shape index: {}]   ;;  %s256_s1 = inlined_call_operand.vmem [shape: f32[128,16], index: 1, kind: input, shape index: {}]   ;;  %s257_s2 = inlined_call_operand.vmem [shape: f32[128,16], index: 2, kind: output, shape index: {}]  }
   0x1   :  { %v11_v0 = vld [vmem:[%s255_s0] sm:$0xff]  ;;  %v12_v2 = vld [vmem:[%s255_s0 + $0x8] sm:$0xff]  ;;  %v13_v5 = vld [vmem:[%s255_s0 + $0x10] sm:$0xff] }
   0x2   :  { %v27_v1 = vld [vmem:[%s256_s1] sm:$0xff]  ;;  %v28_v4 = vld [vmem:[%s256_s1 + $0x8] sm:$0xff]  ;;  %v29_v6 = vld [vmem:[%s256_s1 + $0x10] sm:$0xff] }
   0x3   :  { %v43_v3 = vmax.f32 %v11_v0, %v27_v1  ;;  %v44_v7 = vmax.f32 %v12_v2, %v28_v4  ;;  %v45_v8 = vmax.f32 %v13_v5, %v29_v6  ;;  %v14_v9 = vld [vmem:[%s255_s0 + $0x18] sm:$0xff]  ;;  %v15_v11 = vld [vmem:[%s255_s0 + $0x20] sm:$0xff]  ;;  %v16_v14 = vld [vmem:[%s255_s0 + $0x28] sm:$0xff] }
   0x4   :  { %v30_v10 = vld [vmem:[%s256_s1 + $0x18] sm:$0xff]  ;;  %v31_v13 = vld [vmem:[%s256_s1 + $0x20] sm:$0xff]  ;;  %v32_v15 = vld [vmem:[%s256_s1 + $0x28] sm:$0xff] }
   0x5   :  { %60 = vst.msk [vmem:[%s257_s2] sm:$0xff] %vm59_vm0, %v43_v3  ;;  %v46_v12 = vmax.f32 %v14_v9, %v30_v10  ;;  %61 = vst.msk [vmem:[%s257_s2 + $0x8] sm:$0xff] %vm59_vm0, %v44_v7  ;;  %v47_v16 = vmax.f32 %v15_v11, %v31_v13  ;;  %v48_v17 = vmax.f32 %v16_v14, %v32_v15  ;;  %v17_v18 = vld [vmem:[%s255_s0 + $0x30] sm:$0xff]  ;;  %v18_v20 = vld [vmem:[%s255_s0 + $0x38] sm:$0xff] }
   0x6   :  { %62 = vst.msk [vmem:[%s257_s2 + $0x10] sm:$0xff] %vm59_vm0, %v45_v8  ;;  %v33_v19 = vld [vmem:[%s256_s1 + $0x30] sm:$0xff]  ;;  %v34_v22 = vld [vmem:[%s256_s1 + $0x38] sm:$0xff]  ;;  %v19_v23 = vld [vmem:[%s255_s0 + $0x40] sm:$0xff] }
   0x7   :  { %63 = vst.msk [vmem:[%s257_s2 + $0x18] sm:$0xff] %vm59_vm0, %v46_v12  ;;  %v49_v21 = vmax.f32 %v17_v18, %v33_v19  ;;  %v35_v24 = vld [vmem:[%s256_s1 + $0x40] sm:$0xff]  ;;  %64 = vst.msk [vmem:[%s257_s2 + $0x20] sm:$0xff] %vm59_vm0, %v47_v16  ;;  %v50_v25 = vmax.f32 %v18_v20, %v34_v22  ;;  %v20_v27 = vld [vmem:[%s255_s0 + $0x48] sm:$0xff] }
   0x8   :  { %65 = vst.msk [vmem:[%s257_s2 + $0x28] sm:$0xff] %vm59_vm0, %v48_v17  ;;  %v51_v26 = vmax.f32 %v19_v23, %v35_v24  ;;  %v36_v28 = vld [vmem:[%s256_s1 + $0x48] sm:$0xff]  ;;  %v21_v29 = vld [vmem:[%s255_s0 + $0x50] sm:$0xff]  ;;  %v22_v32 = vld [vmem:[%s255_s0 + $0x58] sm:$0xff] }
   0x9   :  { %66 = vst.msk [vmem:[%s257_s2 + $0x30] sm:$0xff] %vm59_vm0, %v49_v21  ;;  %v52_v30 = vmax.f32 %v20_v27, %v36_v28  ;;  %v37_v31 = vld [vmem:[%s256_s1 + $0x50] sm:$0xff]  ;;  %v38_v33 = vld [vmem:[%s256_s1 + $0x58] sm:$0xff]  ;;  %67 = vst.msk [vmem:[%s257_s2 + $0x38] sm:$0xff] %vm59_vm0, %v50_v25 }
   0xa   :  { %68 = vst.msk [vmem:[%s257_s2 + $0x40] sm:$0xff] %vm59_vm0, %v51_v26  ;;  %v53_v34 = vmax.f32 %v21_v29, %v37_v31  ;;  %v54_v35 = vmax.f32 %v22_v32, %v38_v33  ;;  %v23_v36 = vld [vmem:[%s255_s0 + $0x60] sm:$0xff]  ;;  %v24_v38 = vld [vmem:[%s255_s0 + $0x68] sm:$0xff]  ;;  %v25_v41 = vld [vmem:[%s255_s0 + $0x70] sm:$0xff] }
   0xb   :  { %v39_v37 = vld [vmem:[%s256_s1 + $0x60] sm:$0xff]  ;;  %69 = vst.msk [vmem:[%s257_s2 + $0x48] sm:$0xff] %vm59_vm0, %v52_v30  ;;  %v40_v40 = vld [vmem:[%s256_s1 + $0x68] sm:$0xff]  ;;  %v41_v42 = vld [vmem:[%s256_s1 + $0x70] sm:$0xff] }
   0xc   :  { %v55_v39 = vmax.f32 %v23_v36, %v39_v37  ;;  %70 = vst.msk [vmem:[%s257_s2 + $0x50] sm:$0xff] %vm59_vm0, %v53_v34  ;;  %71 = vst.msk [vmem:[%s257_s2 + $0x58] sm:$0xff] %vm59_vm0, %v54_v35  ;;  %v56_v43 = vmax.f32 %v24_v38, %v40_v40  ;;  %v57_v44 = vmax.f32 %v25_v41, %v41_v42  ;;  %v26_v45 = vld [vmem:[%s255_s0 + $0x78] sm:$0xff] }
   0xd   :  { %v42_v46 = vld [vmem:[%s256_s1 + $0x78] sm:$0xff] }
   0xe   :  { %72 = vst.msk [vmem:[%s257_s2 + $0x60] sm:$0xff] %vm59_vm0, %v55_v39  ;;  %v58_v47 = vmax.f32 %v26_v45, %v42_v46  ;;  %73 = vst.msk [vmem:[%s257_s2 + $0x68] sm:$0xff] %vm59_vm0, %v56_v43 }
   0xf   :  { %74 = vst.msk [vmem:[%s257_s2 + $0x70] sm:$0xff] %vm59_vm0, %v57_v44 }
  0x10   :  { %75 = vst.msk [vmem:[%s257_s2 + $0x78] sm:$0xff] %vm59_vm0, %v58_v47 }

</bundles_post_ra>
